<compile_context>
chip_gen: v7x
topology: tpu7x:2x2x1
jax: 0.10.0
libtpu: 0.0.40
codegen_flags: <defaults>
</compile_context>

<pallas_src>
import functools

import jax
import jax.numpy as jnp
from jax.experimental import pallas as pl
from jax.experimental.pallas import tpu as pltpu

_NEG_MASK = -1e30  # bias for padded output columns -> exp(logit) == 0 in the softmax


def _round_up(x, m):
    return ((x + m - 1) // m) * m


def policy_kernel(x_ref, w1_ref, b1_ref, w2_ref, b2_ref, o_ref, *, out_size):
    # fc1 + ReLU (MXU, f32 accumulation). Weights are pre-cast, so only x may need a cast.
    x = x_ref[...].astype(w1_ref.dtype)
    h = jnp.dot(x, w1_ref[...], preferred_element_type=jnp.float32)
    h = jnp.maximum(h + b1_ref[...], 0.0)                       # (TB, 128) + (1, 128)

    # fc2 (padded output lanes get -1e30 via b2 -> vanish from the softmax)
    logits = jnp.dot(h.astype(w2_ref.dtype), w2_ref[...],
                     preferred_element_type=jnp.float32)
    logits = logits + b2_ref[...]

    # numerically-stable softmax over the lane-dense (padded) last dim
    m = jnp.max(logits, axis=-1, keepdims=True)
    e = jnp.exp(logits - m)                                     # padded cols -> 0
    inv = pl.reciprocal(jnp.sum(e, axis=-1, keepdims=True), approx=True)  # EUP slot
    # Narrow store: only the real output columns go back to HBM.
    o_ref[...] = (e * inv)[:, :out_size].astype(o_ref.dtype)


def prepare_params(w1, b1, w2, b2, *, compute_dtype=jnp.float32):
    """Pad (and optionally cast) parameters ONCE, outside the per-call path.

    w1: (in, hidden), b1: (1, hidden), w2: (hidden, out), b2: (1, out).
    """
    hidden = w1.shape[1]
    out_size = w2.shape[1]
    hid_p = _round_up(hidden, 128)           # lane-dense hidden
    out_p = _round_up(out_size, 128)         # lane-dense logits (compute only)

    w1_p = jnp.pad(w1, ((0, 0), (0, hid_p - hidden))).astype(compute_dtype)
    b1_p = jnp.pad(b1, ((0, 0), (0, hid_p - hidden))).astype(jnp.float32)
    w2_p = jnp.pad(w2, ((0, hid_p - hidden), (0, out_p - out_size))).astype(compute_dtype)
    # padded output columns get a huge negative bias so they vanish from the softmax
    b2_p = jnp.pad(b2, ((0, 0), (0, out_p - out_size)),
                   constant_values=_NEG_MASK).astype(jnp.float32)
    return (w1_p, b1_p, w2_p, b2_p), out_size


@functools.partial(jax.jit, static_argnames=("out_size", "block_b"))
def policy_network_forward(state, w1_p, b1_p, w2_p, b2_p, *, out_size, block_b=4096):
    """state: (B, in). Params must come from prepare_params (already padded/cast)."""
    B, in_size = state.shape
    hid_p = w1_p.shape[1]
    out_p = w2_p.shape[1]

    # Batch tile: aim for >=4 grid steps when B is large (>=2 per v7x TensorCore so the
    # auto-pipeline can overlap prefetch/writeback), capped by block_b, sublane-aligned.
    tb = min(block_b, max(8, _round_up(pl.cdiv(B, 4), 8)))
    b_p = _round_up(B, tb)
    x_p = state if b_p == B else jnp.pad(state, ((0, b_p - B), (0, 0)))

    grid = (b_p // tb,)
    kernel = functools.partial(policy_kernel, out_size=out_size)

    bytes_accessed = (x_p.dtype.itemsize * b_p * in_size
                      + w1_p.dtype.itemsize * in_size * hid_p
                      + w2_p.dtype.itemsize * hid_p * out_p
                      + 4 * (hid_p + out_p)
                      + 4 * b_p * out_size)              # narrow output writeback
    cost = pl.CostEstimate(
        flops=2 * b_p * (in_size * hid_p + hid_p * out_p),
        transcendentals=b_p * out_p,
        bytes_accessed=bytes_accessed,
    )

    out = pl.pallas_call(
        kernel,
        out_shape=jax.ShapeDtypeStruct((b_p, out_size), jnp.float32),
        grid_spec=pltpu.PrefetchScalarGridSpec(
            num_scalar_prefetch=0,
            grid=grid,
            in_specs=[
                pl.BlockSpec((tb, in_size), lambda i: (i, 0)),       # x: tiled over batch
                pl.BlockSpec((in_size, hid_p), lambda i: (0, 0)),    # w1: VMEM-resident
                pl.BlockSpec((1, hid_p), lambda i: (0, 0)),          # b1: resident
                pl.BlockSpec((hid_p, out_p), lambda i: (0, 0)),      # w2: resident
                pl.BlockSpec((1, out_p), lambda i: (0, 0)),          # b2: resident
            ],
            out_specs=pl.BlockSpec((tb, out_size), lambda i: (i, 0)),  # narrow output
        ),
        compiler_params=pltpu.CompilerParams(
            dimension_semantics=("parallel",),                       # 2 TCs on v7x
        ),
        cost_estimate=cost,
    )(x_p, w1_p, b1_p, w2_p, b2_p)

    return out if b_p == B else out[:B]


def init_params(key, input_size, hidden, output_size):
    # Deterministic synthetic init (PyTorch-like uniform fan-in bounds).
    k1, k2, k3, k4 = jax.random.split(key, 4)
    bound1 = 1.0 / jnp.sqrt(input_size)
    bound2 = 1.0 / jnp.sqrt(hidden)
    w1 = jax.random.uniform(k1, (input_size, hidden), jnp.float32, -bound1, bound1)
    b1 = jax.random.uniform(k2, (1, hidden), jnp.float32, -bound1, bound1)
    w2 = jax.random.uniform(k3, (hidden, output_size), jnp.float32, -bound2, bound2)
    b2 = jax.random.uniform(k4, (1, output_size), jnp.float32, -bound2, bound2)
    return w1, b1, w2, b2


def _reference(state, w1, b1, w2, b2):
    h = jnp.maximum(state @ w1 + b1, 0.0)
    return jax.nn.softmax(h @ w2 + b2, axis=-1)


if __name__ == "__main__":
    key = jax.random.PRNGKey(0)
    input_size, hidden, output_size = 16, 64, 8
    k_state, k_params, k_big = jax.random.split(key, 3)
    w1, b1, w2, b2 = init_params(k_params, input_size, hidden, output_size)

    # Pad / cast parameters ONCE (hoisted out of the per-call path).
    (w1_p, b1_p, w2_p, b2_p), out_size = prepare_params(w1, b1, w2, b2)

    # --- small (module-spec sized) check: batch=2 ---
    batch = 2
    state = jax.random.normal(k_state, (batch, input_size), jnp.float32)
    probs = policy_network_forward(state, w1_p, b1_p, w2_p, b2_p, out_size=out_size)
    probs = jax.block_until_ready(probs)
    assert probs.shape == (batch, output_size)
    assert jnp.allclose(jnp.sum(probs, axis=-1), 1.0, atol=1e-3)
    assert jnp.allclose(probs, _reference(state, w1, b1, w2, b2), atol=1e-3)

    # --- larger batch to exercise the batch grid (4 tiles of 1024) ---
    big_state = jax.random.normal(k_big, (4096, input_size), jnp.float32)
    big_probs = jax.block_until_ready(
        policy_network_forward(big_state, w1_p, b1_p, w2_p, b2_p, out_size=out_size))
    assert big_probs.shape == (4096, output_size)
    assert jnp.allclose(jnp.sum(big_probs, axis=-1), 1.0, atol=1e-3)
    assert jnp.allclose(big_probs, _reference(big_state, w1, b1, w2, b2), atol=1e-3)

    print("KERNEL_OK")
</pallas_src>

<mosaic_0001>
module attributes {stable_mosaic.version = 11 : i64} {
  func.func @policy_kernel(%arg0: i32, %arg1: memref<8x16xf32, #tpu.memory_space<vmem>>, %arg2: memref<16x128xf32, #tpu.memory_space<vmem>>, %arg3: memref<1x128xf32, #tpu.memory_space<vmem>>, %arg4: memref<128x128xf32, #tpu.memory_space<vmem>>, %arg5: memref<1x128xf32, #tpu.memory_space<vmem>>, %arg6: memref<8x8xf32, #tpu.memory_space<vmem>>) attributes {dimension_semantics = [#tpu.dimension_semantics<parallel>], iteration_bounds = array<i64: 1>, scalar_prefetch = 0 : i64, scratch_operands = 0 : i64, tpu.core_type = #tpu.core_type<tc>, window_params = [{transform_indices = @transform_0, window_bounds = array<i64: 8, 16>}, {pipeline_mode = #tpu.pipeline_mode<synchronous>, transform_indices = @transform_1, window_bounds = array<i64: 16, 128>}, {pipeline_mode = #tpu.pipeline_mode<synchronous>, transform_indices = @transform_2, window_bounds = array<i64: 1, 128>}, {pipeline_mode = #tpu.pipeline_mode<synchronous>, transform_indices = @transform_3, window_bounds = array<i64: 128, 128>}, {pipeline_mode = #tpu.pipeline_mode<synchronous>, transform_indices = @transform_4, window_bounds = array<i64: 1, 128>}, {transform_indices = @transform_5, window_bounds = array<i64: 8, 8>}]} {
    %c0 = arith.constant 0 : index
    %c0_0 = arith.constant 0 : index
    %0 = vector.load %arg1[%c0, %c0_0] : memref<8x16xf32, #tpu.memory_space<vmem>>, vector<8x16xf32>
    %c0_1 = arith.constant 0 : index
    %c0_2 = arith.constant 0 : index
    %1 = vector.load %arg2[%c0_1, %c0_2] : memref<16x128xf32, #tpu.memory_space<vmem>>, vector<16x128xf32>
    %cst = arith.constant dense<0.000000e+00> : vector<8x128xf32>
    %2 = tpu.matmul %0, %1, %cst {dimension_numbers = #tpu.dot_dimension_numbers<[1], [0], [0], [1], [0, 0, 1, 1], [], []>} : vector<8x16xf32>, vector<16x128xf32>, vector<8x128xf32> -> vector<8x128xf32>
    %c0_3 = arith.constant 0 : index
    %c0_4 = arith.constant 0 : index
    %3 = vector.load %arg3[%c0_3, %c0_4] : memref<1x128xf32, #tpu.memory_space<vmem>>, vector<1x128xf32>
    %4 = vector.broadcast %3 : vector<1x128xf32> to vector<8x128xf32>
    %5 = arith.addf %2, %4 : vector<8x128xf32>
    %cst_5 = arith.constant 0.000000e+00 : f32
    %6 = vector.broadcast %cst_5 : f32 to vector<8x128xf32>
    %7 = arith.maximumf %5, %6 : vector<8x128xf32>
    %c0_6 = arith.constant 0 : index
    %c0_7 = arith.constant 0 : index
    %8 = vector.load %arg4[%c0_6, %c0_7] : memref<128x128xf32, #tpu.memory_space<vmem>>, vector<128x128xf32>
    %cst_8 = arith.constant dense<0.000000e+00> : vector<8x128xf32>
    %9 = tpu.matmul %7, %8, %cst_8 {dimension_numbers = #tpu.dot_dimension_numbers<[1], [0], [0], [1], [0, 0, 1, 1], [], []>} : vector<8x128xf32>, vector<128x128xf32>, vector<8x128xf32> -> vector<8x128xf32>
    %c0_9 = arith.constant 0 : index
    %c0_10 = arith.constant 0 : index
    %10 = vector.load %arg5[%c0_9, %c0_10] : memref<1x128xf32, #tpu.memory_space<vmem>>, vector<1x128xf32>
    %11 = vector.broadcast %10 : vector<1x128xf32> to vector<8x128xf32>
    %12 = arith.addf %9, %11 : vector<8x128xf32>
    %cst_11 = arith.constant dense<0xFF800000> : vector<8xf32>
    %13 = vector.multi_reduction <maximumf>, %12, %cst_11 [1] : vector<8x128xf32> to vector<8xf32>
    %14 = vector.shape_cast %13 : vector<8xf32> to vector<8x1xf32>
    %15 = vector.broadcast %14 : vector<8x1xf32> to vector<8x128xf32>
    %16 = arith.subf %12, %15 : vector<8x128xf32>
    %17 = math.exp %16 : vector<8x128xf32>
    %cst_12 = arith.constant dense<0.000000e+00> : vector<8xf32>
    %18 = vector.multi_reduction <add>, %17, %cst_12 [1] : vector<8x128xf32> to vector<8xf32>
    %19 = vector.shape_cast %18 : vector<8xf32> to vector<8x1xf32>
    %20 = tpu.reciprocal %19 {approx = true} : vector<8x1xf32> -> vector<8x1xf32>
    %21 = vector.broadcast %20 : vector<8x1xf32> to vector<8x128xf32>
    %22 = arith.mulf %17, %21 : vector<8x128xf32>
    %23 = vector.extract_strided_slice %22 {offsets = [0, 0], sizes = [8, 8], strides = [1, 1]} : vector<8x128xf32> to vector<8x8xf32>
    %c0_13 = arith.constant 0 : index
    %c0_14 = arith.constant 0 : index
    %24 = vector.load %arg6[%c0_13, %c0_14] : memref<8x8xf32, #tpu.memory_space<vmem>>, vector<8x8xf32>
    tpu.vector_store %arg6[%c0_13, %c0_14], %23 {strides = array<i32>} : memref<8x8xf32, #tpu.memory_space<vmem>>, vector<8x8xf32>,
    return
  }
  func.func @transform_0(%arg0: i32) -> (i32, i32) {
    %c0_i32 = arith.constant 0 : i32
    %c0_i32_0 = arith.constant 0 : i32
    return %arg0, %c0_i32 : i32, i32
  }
  func.func @transform_1(%arg0: i32) -> (i32, i32) {
    %c0_i32 = arith.constant 0 : i32
    %c0_i32_0 = arith.constant 0 : i32
    %c0_i32_1 = arith.constant 0 : i32
    return %c0_i32, %c0_i32_0 : i32, i32
  }
  func.func @transform_2(%arg0: i32) -> (i32, i32) {
    %c0_i32 = arith.constant 0 : i32
    %c0_i32_0 = arith.constant 0 : i32
    %c0_i32_1 = arith.constant 0 : i32
    return %c0_i32, %c0_i32_0 : i32, i32
  }
  func.func @transform_3(%arg0: i32) -> (i32, i32) {
    %c0_i32 = arith.constant 0 : i32
    %c0_i32_0 = arith.constant 0 : i32
    %c0_i32_1 = arith.constant 0 : i32
    return %c0_i32, %c0_i32_0 : i32, i32
  }
  func.func @transform_4(%arg0: i32) -> (i32, i32) {
    %c0_i32 = arith.constant 0 : i32
    %c0_i32_0 = arith.constant 0 : i32
    %c0_i32_1 = arith.constant 0 : i32
    return %c0_i32, %c0_i32_0 : i32, i32
  }
  func.func @transform_5(%arg0: i32) -> (i32, i32) {
    %c0_i32 = arith.constant 0 : i32
    %c0_i32_0 = arith.constant 0 : i32
    return %arg0, %c0_i32 : i32, i32
  }
}

</mosaic_0001>

<bundles_post_ra>
// kernel: policy_network_forward.1
= control target key start
LH: loop header
LB: loop body
LE: loop exit
PB: predicated region body
PF: predicated region fallthrough
CT: control target
= control target key end

     0   :  { %10 = vsyncpa [#allocation3], 0  ;;  %s467_s0 = inlined_call_operand.vmem [shape: f32[8,16], index: 0, kind: input, shape index: {}]   ;;  %s468_s1 = inlined_call_operand.hbm [shape: f32[16,128], index: 1, kind: input, shape index: {}]   ;;  %s469_s2 = inlined_call_operand.vmem [shape: f32[1,128], index: 2, kind: input, shape index: {}]   ;;  %s470_s3 = inlined_call_operand.hbm [shape: f32[128,128], index: 3, kind: input, shape index: {}]   ;;  %s471_s4 = inlined_call_operand.vmem [shape: f32[1,128], index: 4, kind: input, shape index: {}]   ;;  %s472_s5 = inlined_call_operand.vmem [shape: f32[8,8], index: 5, kind: output, shape index: {}]  }
   0x1   :  { %11 = vsyncpa [#allocation5], 0  ;;  %s394_s18 = smov [#allocation2]   ;;  %s346_s22 = scalar_lea.hbm %s468_s1, 256 }
   0x2   :  { %s19_s19 = sshll.u32 %s394_s18, 4  ;;  %p347_p0 = scmp.ne.s32.totalorder %s468_s1, %s346_s22  ;;  %s20_s19 = int_to_ptr.vmem [resolvable:$true] %s19_s19 }
   0x3   :  { %p350_p1 = scmp.lt.u32.totalorder %s346_s22, %s468_s1 }
   0x5   :  { %p352_p2 = pnand %p350_p1, %p347_p0 }
   0x7   :  { %355 = shalt.err (!%p352_p2)
}
   0x8   :  { %s356_s27 = scalar_lea.vmem %s20_s19, 256  ;;  %p361_p4 = scmp.lt.s32.totalorder %s20_s19, %s20_s19 }
   0x9   :  { %p357_p3 = scmp.ne.s32.totalorder %s20_s19, %s356_s27  ;;  %p362_p5 = scmp.lt.s32.totalorder %s356_s27, %s356_s27 }
   0xb   :  { %p363_p6 = por %p362_p5, %p361_p4 }
   0xd   :  { %p364_p7 = pnand %p363_p6, %p357_p3 }
   0xf   :  { %367 = shalt.err (!%p364_p7)
}
  0x10   :  { %s395_s28 = smov 128   ;;  %s396_s29 = smov 8  }
  0x11   :  { %25 = dma.hbm_to_vmem [thread:$0]  %s468_s1, 256, %s20_s19, [#allocation3], %s395_s28, %s395_s28, %s396_s29  }
  0x12   :  { %s397_s7 = smov [#allocation4]   ;;  %s368_s11 = scalar_lea.hbm %s470_s3, 2048 }
  0x13   :  { %s33_s8 = sshll.u32 %s397_s7, 4  ;;  %p369_p8 = scmp.ne.s32.totalorder %s470_s3, %s368_s11  ;;  %s34_s8 = int_to_ptr.vmem [resolvable:$true] %s33_s8 }
  0x14   :  { %p372_p9 = scmp.lt.u32.totalorder %s368_s11, %s470_s3 }
  0x16   :  { %p374_p10 = pnand %p372_p9, %p369_p8 }
  0x18   :  { %377 = shalt.err (!%p374_p10)
}
  0x19   :  { %s378_s16 = scalar_lea.vmem %s34_s8, 2048  ;;  %p383_p12 = scmp.lt.s32.totalorder %s34_s8, %s34_s8 }
  0x1a   :  { %p379_p11 = scmp.ne.s32.totalorder %s34_s8, %s378_s16  ;;  %p384_p13 = scmp.lt.s32.totalorder %s378_s16, %s378_s16 }
  0x1c   :  { %p385_p0 = por %p384_p13, %p383_p12 }
  0x1e   :  { %p386_p1 = pnand %p385_p0, %p379_p11 }
  0x20   :  { %389 = shalt.err (!%p386_p1)
}
  0x21   :  { %39 = dma.hbm_to_vmem [thread:$0]  %s470_s3, 2048, %s34_s8, [#allocation5], %s395_s28, %s395_s28, %s396_s29  }
  0x22   :  { %390 = dma.done.wait [#allocation3], 256  }
  0x23   :  { %391 = vsyncadd [#allocation3], 4294967040 }
  0x24   :  { %392 = dma.done.wait [#allocation5], 2048  }
  0x25   :  { %393 = vsyncadd [#allocation5], 4294965248  ;;  %v398_v0 = vmov 0.0|0.0   ;;  %vm399_vm0 = vmmov 0   ;;  %v400_v1 = vmov 0.0   ;;  %v49_v2 = vld [vmem:[#allocation2] sm:$0xff] }
  0x26   :  { %308 = vmatprep.subr.bf16.mxu0 %v398_v0  ;;  %270 = vmatprep.mubr.msk.f32.mxu0 %vm399_vm0, %v400_v1  ;;  %v50_v3 = vld [vmem:[#allocation2 + $0x8] sm:$0xff]  ;;  %v133_v5 = vld [vmem:[#allocation4] sm:$0xff]  ;;  %v134_v6 = vld [vmem:[#allocation4 + $0x8] sm:$0xff]  ;;  %vm58_vm1 = vcmask 130048   ;;  %vm235_vm2 = vcmask 64512  }
  0x27   :  { %311 = vmatprep.subr.bf16.mxu1 %v398_v0  ;;  %305 = vmatprep.mubr.msk.f32.mxu1 %vm399_vm0, %v400_v1  ;;  %v309_v4 = vpack.c.bf16 %v50_v3, %v49_v2  ;;  %v135_v7 = vld [vmem:[#allocation4 + $0x10] sm:$0xff]  ;;  %v312_v8 = vpack.c.bf16 %v134_v6, %v133_v5  ;;  %v136_v9 = vld [vmem:[#allocation4 + $0x18] sm:$0xff]  ;;  %v137_v12 = vld [vmem:[#allocation4 + $0x20] sm:$0xff] }
  0x28   :  { %v48_v10 = vld [vmem:[%s467_s0] sm:$0xff]  ;;  %v315_v11 = vpack.c.bf16 %v136_v9, %v135_v7  ;;  %v138_v13 = vld [vmem:[#allocation4 + $0x28] sm:$0xff]  ;;  %v140_v16 = vld [vmem:[#allocation4 + $0x38] sm:$0xff] }
  0x29   :  { %310 = vmatpush3.bf16.msra.mxu0 %v309_v4  ;;  %313 = vmatpush3.bf16.msra.mxu1 %v312_v8  ;;  %v318_v14 = vpack.c.bf16 %v138_v13, %v137_v12  ;;  %v139_v15 = vld [vmem:[#allocation4 + $0x30] sm:$0xff]  ;;  %v141_v18 = vld [vmem:[#allocation4 + $0x40] sm:$0xff]  ;;  %v142_v19 = vld [vmem:[#allocation4 + $0x48] sm:$0xff] }
  0x2a   :  { %314 = vmatprep.subr.bf16.mxu1 %v398_v0  ;;  %v321_v17 = vpack.c.bf16 %v140_v16, %v139_v15  ;;  %v324_v20 = vpack.c.bf16 %v142_v19, %v141_v18  ;;  %v143_v21 = vld [vmem:[#allocation4 + $0x50] sm:$0xff]  ;;  %v144_v22 = vld [vmem:[#allocation4 + $0x58] sm:$0xff]  ;;  %v145_v24 = vld [vmem:[#allocation4 + $0x60] sm:$0xff] }
  0x2b   :  { %v327_v23 = vpack.c.bf16 %v144_v22, %v143_v21  ;;  %v146_v25 = vld [vmem:[#allocation4 + $0x68] sm:$0xff]  ;;  %v147_v27 = vld [vmem:[#allocation4 + $0x70] sm:$0xff]  ;;  %v148_v28 = vld [vmem:[#allocation4 + $0x78] sm:$0xff] }
  0x2c   :  { %271 = vmatmul.mubr.msk.f32.vlgmr.msra.gmra.mrb[0].mxu0 %vm58_vm1, %v48_v10  ;;  %v330_v26 = vpack.c.bf16 %v146_v25, %v145_v24  ;;  %v333_v29 = vpack.c.bf16 %v148_v28, %v147_v27  ;;  %v243_v30 = vld [vmem:[%s469_s2] ss:$0 sm:$0xff] }
  0x2d   :  { %316 = vmatpush3.bf16.msra.mxu1 %v315_v11  ;;  %v245_v35 = vld [vmem:[%s471_s4] ss:$0 sm:$0xff] }
  0x2e   :  { %317 = vmatprep.subr.bf16.mxu1 %v398_v0 }
  0x31   :  { %319 = vmatpush3.bf16.msra.mxu1 %v318_v14 }
  0x32   :  { %320 = vmatprep.subr.bf16.mxu1 %v398_v0 }
  0x35   :  { %322 = vmatpush3.bf16.msra.mxu1 %v321_v17 }
  0x36   :  { %323 = vmatprep.subr.bf16.mxu1 %v398_v0 }
  0x39   :  { %325 = vmatpush3.bf16.msra.mxu1 %v324_v20 }
  0x3a   :  { %326 = vmatprep.subr.bf16.mxu1 %v398_v0 }
  0x3d   :  { %328 = vmatpush3.bf16.msra.mxu1 %v327_v23 }
  0x3e   :  { %329 = vmatprep.subr.bf16.mxu1 %v398_v0 }
  0x41   :  { %331 = vmatpush3.bf16.msra.mxu1 %v330_v26 }
  0x42   :  { %332 = vmatprep.subr.bf16.mxu1 %v398_v0 }
  0x45   :  { %334 = vmatpush3.bf16.msra.mxu1 %v333_v29 }
  0xff   :  { %v128_v31 = vpop.f32.mrb[0].mxu0 }
 0x100   :  { %v129_v32 = vadd.f32 %v243_v30, %v128_v31  ;;  %v272_v33 = vpop.f32.mrb[1].mxu0 }
 0x102   :  { %v132_v34 = vmax.f32 %v129_v32, 0.0 }
 0x104   :  { %306 = vmatmul.mubr.f32.vlgmr.msra.gmra.mrb[0].mxu1 %v132_v34 }
 0x1d7   :  { %v222_v36 = vpop.f32.mrb[0].mxu1 }
 0x1d8   :  { %v223_v37 = vadd.f32 %v245_v35, %v222_v36  ;;  %v307_v38 = vpop.f32.mrb[1].mxu1 }
 0x1da   :  { %226 = vmax.xlane.f32.xlu0 %v223_v37 }
 0x267   :  { %v227_v39 = vpop.xlane.xlu0 %226 }
 0x268   :  { %v228_v40 = vsub.f32 %v223_v37, %v227_v39 }
 0x26a   :  { %v229_v41 = vmul.f32 1.442695, %v228_v40 }
 0x26c   :  { %342 = vpow2.f32 %v229_v41 }
 0x276   :  { %v343_v42 = vpop.eup %342 }
 0x277   :  { %231 = vadd.xlane.f32.xlu0 %v343_v42 }
 0x304   :  { %v232_v43 = vpop.xlane.xlu0 %231 }
 0x305   :  { %344 = vrcp.f32 %v232_v43 }
 0x30f   :  { %v345_v44 = vpop.eup %344 }
 0x310   :  { %v234_v45 = vmul.f32 %v345_v44, %v343_v42 }
 0x312   :  { %236 = vst.msk [vmem:[%s472_s5] sm:$0xff] %vm235_vm2, %v234_v45 }
 0x313   :  { %241 = vsyncpa [#allocation3], 1 }
 0x314   :  { %242 = vsyncpa [#allocation5], 1 }

</bundles_post_ra>
